<compile_context>
chip_gen: v6e
topology: v6e:2x2x1
jax: 0.10.0
libtpu: 0.0.40
codegen_flags: <defaults>
</compile_context>

<pallas_src>
import jax
import jax.numpy as jnp
from jax.experimental import pallas as pl
from jax.experimental.pallas import tpu as pltpu

LANE = 128     # lane width (last-dim tile)
SUBLANE = 8    # f32 sublane width (second-to-last-dim tile)

# Tile sizes for the tiled scaling path.
_TM, _TN, _TK = 128, 128, 128

# Use the single-block (grid-less) kernel while the whole padded working set
# fits comfortably in VMEM; 16 MiB leaves headroom under v7x's 32 MiB scoped
# default (64 MiB physical).
_SINGLE_BLOCK_VMEM_LIMIT = 16 * 1024 * 1024


def _round_up(n, m):
    return ((n + m - 1) // m) * m


# ---------------------------------------------------------------------------
# Parameter prep: run ONCE, outside the per-step hot path.
# ---------------------------------------------------------------------------
def prepare_params(w, b):
    """Pre-transpose + zero-pad nn.Linear params to (8,128)-aligned tiles.

    w: [out_features, in_features] (PyTorch Linear layout), b: [out_features].
    Returns (wT_p [kp, np], b_p [1, np]) with kp/np multiples of 128.
    Zero padding keeps the contraction exact.
    """
    out_f, in_f = w.shape
    kp = _round_up(in_f, LANE)
    np_ = _round_up(out_f, LANE)
    wT_p = jnp.zeros((kp, np_), w.dtype).at[:in_f, :out_f].set(w.T)
    b_p = jnp.zeros((1, np_), b.dtype).at[0, :out_f].set(b)
    return wT_p, b_p


# ---------------------------------------------------------------------------
# Kernels
# ---------------------------------------------------------------------------
def _mycell_kernel_single(x_ref, h_ref, wT_ref, b_ref, o_ref):
    # Whole (padded) problem is one VMEM block: single MXU push, no transpose,
    # f32 VPU/EUP epilogue, lane-dense unmasked store.
    y = jnp.dot(x_ref[...], wT_ref[...], preferred_element_type=jnp.float32)
    o_ref[...] = jnp.tanh(y + b_ref[...] + h_ref[...]).astype(o_ref.dtype)


def _mycell_kernel_tiled(x_ref, h_ref, wT_ref, b_ref, o_ref, acc_ref):
    # Grid = (M tiles, N tiles, K tiles); K is innermost / "arbitrary".
    k = pl.program_id(2)

    @pl.when(k == 0)
    def _():
        acc_ref[...] = jnp.zeros_like(acc_ref)

    acc_ref[...] += jnp.dot(x_ref[...], wT_ref[...],
                            preferred_element_type=jnp.float32)

    @pl.when(k == pl.num_programs(2) - 1)
    def _():
        o_ref[...] = jnp.tanh(
            acc_ref[...] + b_ref[...] + h_ref[...].astype(jnp.float32)
        ).astype(o_ref.dtype)


# ---------------------------------------------------------------------------
# Forward wrappers
# ---------------------------------------------------------------------------
def _cost_estimate(bp, kp, np_):
    return pl.CostEstimate(
        flops=2 * bp * kp * np_,
        transcendentals=bp * np_,
        bytes_accessed=4 * (bp * kp + 2 * bp * np_ + kp * np_ + np_),
    )


@jax.jit
def _forward_single_block(x, h, wT_p, b_p):
    batch, in_f = x.shape
    out_f = h.shape[1]
    kp, np_ = wT_p.shape
    bp = _round_up(batch, SUBLANE)

    # Only the per-step activations are padded here (params are pre-padded).
    x_p = jnp.zeros((bp, kp), x.dtype).at[:batch, :in_f].set(x)
    h_p = jnp.zeros((bp, np_), x.dtype).at[:batch, :out_f].set(h.astype(x.dtype))

    new_h_p = pl.pallas_call(
        _mycell_kernel_single,
        out_shape=jax.ShapeDtypeStruct((bp, np_), x.dtype),
        compiler_params=pltpu.CompilerParams(
            allow_input_fusion=[True, True, True, True],
        ),
        cost_estimate=_cost_estimate(bp, kp, np_),
    )(x_p, h_p, wT_p, b_p)

    new_h = new_h_p[:batch, :out_f]
    return new_h, new_h


@jax.jit
def _forward_tiled(x, h, wT_p, b_p):
    batch, in_f = x.shape
    out_f = h.shape[1]
    kp, np_ = wT_p.shape
    bp = _round_up(batch, _TM)

    x_p = jnp.zeros((bp, kp), x.dtype).at[:batch, :in_f].set(x)
    h_p = jnp.zeros((bp, np_), x.dtype).at[:batch, :out_f].set(h.astype(x.dtype))

    grid = (bp // _TM, np_ // _TN, kp // _TK)

    new_h_p = pl.pallas_call(
        _mycell_kernel_tiled,
        out_shape=jax.ShapeDtypeStruct((bp, np_), x.dtype),
        grid_spec=pltpu.PrefetchScalarGridSpec(
            num_scalar_prefetch=0,
            grid=grid,
            in_specs=[
                pl.BlockSpec((_TM, _TK), lambda i, j, k: (i, k)),   # x
                pl.BlockSpec((_TM, _TN), lambda i, j, k: (i, j)),   # h
                pl.BlockSpec((_TK, _TN), lambda i, j, k: (k, j)),   # wT
                pl.BlockSpec((1, _TN), lambda i, j, k: (0, j)),     # b
            ],
            out_specs=pl.BlockSpec((_TM, _TN), lambda i, j, k: (i, j)),
            scratch_shapes=[pltpu.VMEM((_TM, _TN), jnp.float32)],
        ),
        compiler_params=pltpu.CompilerParams(
            dimension_semantics=("parallel", "parallel", "arbitrary"),
        ),
        cost_estimate=_cost_estimate(bp, kp, np_),
    )(x_p, h_p, wT_p, b_p)

    new_h = new_h_p[:batch, :out_f]
    return new_h, new_h


def mycell_forward(x, h, wT_p, b_p):
    """new_h = tanh(x @ W^T + b + h); returns (new_h, new_h)."""
    batch = x.shape[0]
    kp, np_ = wT_p.shape
    bp = _round_up(batch, SUBLANE)
    itemsize = jnp.dtype(x.dtype).itemsize
    single_block_bytes = itemsize * (bp * kp + 2 * bp * np_ + kp * np_ + np_)
    if single_block_bytes <= _SINGLE_BLOCK_VMEM_LIMIT:
        return _forward_single_block(x, h, wT_p, b_p)
    return _forward_tiled(x, h, wT_p, b_p)


if __name__ == "__main__":
    key = jax.random.PRNGKey(0)
    kx, kh, kw, kb = jax.random.split(key, 4)

    # Shapes from the PyTorch module: x, h ~ (3, 4); Linear(4, 4).
    batch, feat = 3, 4
    x = jax.random.uniform(kx, (batch, feat), dtype=jnp.float32)
    h = jax.random.uniform(kh, (batch, feat), dtype=jnp.float32)

    # Deterministic synthetic params, mimicking nn.Linear's uniform init.
    bound = 1.0 / jnp.sqrt(jnp.float32(feat))
    w = jax.random.uniform(kw, (feat, feat), dtype=jnp.float32,
                           minval=-bound, maxval=bound)
    b = jax.random.uniform(kb, (feat,), dtype=jnp.float32,
                           minval=-bound, maxval=bound)

    # Parameter prep: ONCE, outside the per-step hot path.
    wT_p, b_p = prepare_params(w, b)

    new_h, new_h_again = mycell_forward(x, h, wT_p, b_p)
    jax.block_until_ready(new_h)

    # Pure-JAX reference check (module semantics).
    ref = jnp.tanh(x @ w.T + b + h)
    assert new_h.shape == (batch, feat)
    assert jnp.allclose(new_h, ref, atol=1e-5, rtol=1e-5)
    assert jnp.array_equal(new_h, new_h_again)

    # Also exercise the tiled (v7x-safe) scaling path at a modest size.
    B2, K2, N2 = 256, 384, 256
    x2 = jax.random.uniform(kx, (B2, K2), dtype=jnp.float32)
    h2 = jax.random.uniform(kh, (B2, N2), dtype=jnp.float32)
    w2 = jax.random.uniform(kw, (N2, K2), dtype=jnp.float32,
                            minval=-0.05, maxval=0.05)
    b2 = jax.random.uniform(kb, (N2,), dtype=jnp.float32,
                            minval=-0.05, maxval=0.05)
    wT2_p, b2_p = prepare_params(w2, b2)
    new_h2, _ = _forward_tiled(x2, h2, wT2_p, b2_p)
    jax.block_until_ready(new_h2)
    ref2 = jnp.tanh(x2 @ w2.T + b2 + h2)
    assert jnp.allclose(new_h2, ref2, atol=1e-4, rtol=1e-4)

    print("KERNEL_OK")
</pallas_src>

<mosaic_0001>
module attributes {stable_mosaic.version = 11 : i64} {
  func.func @_mycell_kernel_single(%arg0: memref<8x128xf32, #tpu.memory_space<vmem>>, %arg1: memref<8x128xf32, #tpu.memory_space<vmem>>, %arg2: memref<128x128xf32, #tpu.memory_space<vmem>>, %arg3: memref<1x128xf32, #tpu.memory_space<vmem>>, %arg4: memref<8x128xf32, #tpu.memory_space<vmem>>) attributes {dimension_semantics = [], scalar_prefetch = 0 : i64, scratch_operands = 0 : i64, tpu.core_type = #tpu.core_type<tc>} {
    %c0 = arith.constant 0 : index
    %c0_0 = arith.constant 0 : index
    %0 = vector.load %arg0[%c0, %c0_0] : memref<8x128xf32, #tpu.memory_space<vmem>>, vector<8x128xf32>
    %c0_1 = arith.constant 0 : index
    %c0_2 = arith.constant 0 : index
    %1 = vector.load %arg2[%c0_1, %c0_2] : memref<128x128xf32, #tpu.memory_space<vmem>>, vector<128x128xf32>
    %cst = arith.constant dense<0.000000e+00> : vector<8x128xf32>
    %2 = tpu.matmul %0, %1, %cst {dimension_numbers = #tpu.dot_dimension_numbers<[1], [0], [0], [1], [0, 0, 1, 1], [], []>} : vector<8x128xf32>, vector<128x128xf32>, vector<8x128xf32> -> vector<8x128xf32>
    %c0_3 = arith.constant 0 : index
    %c0_4 = arith.constant 0 : index
    %3 = vector.load %arg3[%c0_3, %c0_4] : memref<1x128xf32, #tpu.memory_space<vmem>>, vector<1x128xf32>
    %4 = vector.broadcast %3 : vector<1x128xf32> to vector<8x128xf32>
    %5 = arith.addf %2, %4 : vector<8x128xf32>
    %c0_5 = arith.constant 0 : index
    %c0_6 = arith.constant 0 : index
    %6 = vector.load %arg1[%c0_5, %c0_6] : memref<8x128xf32, #tpu.memory_space<vmem>>, vector<8x128xf32>
    %7 = arith.addf %5, %6 : vector<8x128xf32>
    %8 = math.tanh %7 : vector<8x128xf32>
    %c0_7 = arith.constant 0 : index
    %c0_8 = arith.constant 0 : index
    %9 = vector.load %arg4[%c0_7, %c0_8] : memref<8x128xf32, #tpu.memory_space<vmem>>, vector<8x128xf32>
    tpu.vector_store %arg4[%c0_7, %c0_8], %8 {strides = array<i32>} : memref<8x128xf32, #tpu.memory_space<vmem>>, vector<8x128xf32>,
    return
  }
}

</mosaic_0001>

<bundles_post_ra>
// kernel: _forward_single_block.2
= control target key start
LH: loop header
LB: loop body
LE: loop exit
PB: predicated region body
PF: predicated region fallthrough
CT: control target
= control target key end

     0   :  { %s380_s0 = inlined_call_operand.hbm [shape: f32[128,128], index: 0, kind: input, shape index: {}]   ;;  %s381_s1 = inlined_call_operand.vmem [shape: f32[1,128], index: 1, kind: input, shape index: {}]   ;;  %s382_s2 = inlined_call_operand.hbm [shape: f32[3,4], index: 2, kind: input, shape index: {}]   ;;  %s383_s3 = inlined_call_operand.<no memory space> [shape: f32[], index: 3, kind: input, shape index: {}]   ;;  %s384_s4 = inlined_call_operand.hbm [shape: f32[3,4], index: 4, kind: input, shape index: {}]   ;;  %s385_s5 = inlined_call_operand.vmem [shape: f32[8,128], index: 5, kind: output, shape index: {}]  }
   0x1   :  { %v355_v0 = vstv %s383_s3 }
   0x2   :  { %12 = vsyncpa [#allocation13], 0 }
   0x3   :  { %13 = vsyncpa [#allocation15], 0  ;;  %s315_s20 = smov [#allocation14]   ;;  %s316_s22 = smov [#allocation12]  }
   0x4   :  { %s30_s21 = sshll.u32 %s315_s20, 4  ;;  %s20_s23 = sshll.u32 %s316_s22, 4  ;;  %s31_s21 = int_to_ptr.vmem [resolvable:$true] %s30_s21  ;;  %s21_s23 = int_to_ptr.vmem [resolvable:$true] %s20_s23 }
   0x5   :  { %s259_s24 = scalar_lea.vmem %s31_s21, 64  ;;  %p264_p1 = scmp.lt.s32.totalorder %s31_s21, %s31_s21 }
   0x6   :  { %p260_p0 = scmp.ne.s32.totalorder %s31_s21, %s259_s24  ;;  %p265_p2 = scmp.lt.s32.totalorder %s259_s24, %s259_s24 }
   0x8   :  { %p266_p3 = por %p265_p2, %p264_p1 }
   0xa   :  { %p267_p4 = pnand %p266_p3, %p260_p0 }
   0xc   :  { %270 = shalt.err (!%p267_p4)
}
   0xd   :  { %33 = dma.hbm_to_vmem [thread:$0]  %s382_s2, 64, %s31_s21, [#allocation15]  }
   0xe   :  { %s279_s3 = scalar_lea.vmem %s21_s23, 64  ;;  %p284_p6 = scmp.lt.s32.totalorder %s21_s23, %s21_s23 }
   0xf   :  { %p280_p5 = scmp.ne.s32.totalorder %s21_s23, %s279_s3  ;;  %p285_p7 = scmp.lt.s32.totalorder %s279_s3, %s279_s3 }
  0x11   :  { %p286_p8 = por %p285_p7, %p284_p6 }
  0x13   :  { %p287_p9 = pnand %p286_p8, %p280_p5 }
  0x15   :  { %290 = shalt.err (!%p287_p9)
}
  0x16   :  { %23 = dma.hbm_to_vmem [thread:$0]  %s384_s4, 64, %s21_s23, [#allocation13]  }
  0x17   :  { %s317_s29 = smov [#allocation16]  }
  0x18   :  { %s39_s30 = sshll.u32 %s317_s29, 4  ;;  %s40_s30 = int_to_ptr.vmem [resolvable:$true] %s39_s30 }
  0x19   :  { %s299_s6 = scalar_lea.vmem %s40_s30, 2048  ;;  %p304_p11 = scmp.lt.s32.totalorder %s40_s30, %s40_s30 }
  0x1a   :  { %p300_p10 = scmp.ne.s32.totalorder %s40_s30, %s299_s6  ;;  %p305_p12 = scmp.lt.s32.totalorder %s299_s6, %s299_s6 }
  0x1c   :  { %p306_p13 = por %p305_p12, %p304_p11 }
  0x1e   :  { %p307_p0 = pnand %p306_p13, %p300_p10 }
  0x20   :  { %310 = shalt.err (!%p307_p0)
}
  0x21   :  { %s318_s2 = smov 128   ;;  %s319_s7 = smov 8  }
  0x22   :  { %45 = dma.hbm_to_vmem [thread:$0]  %s380_s0, 2048, %s40_s30, [#allocation15], %s318_s2, %s318_s2, %s319_s7  }
  0x23   :  { %311 = dma.done.wait [#allocation13], 64  }
  0x24   :  { %312 = vsyncadd [#allocation13], 4294967232 }
  0x25   :  { %313 = dma.done.wait [#allocation15], 2112  }
  0x26   :  { %314 = vsyncadd [#allocation15], 4294965184  ;;  %v320_v1 = vmov 0.0   ;;  %vm321_vm0 = vmmov 0   ;;  %v58_v2 = vlaneseq  ;;  %v101_v3 = vld [vmem:[#allocation16 + $0x78] sm:$0xff]  ;;  %v100_v4 = vld [vmem:[#allocation16 + $0x70] sm:$0xff] }
  0x27   :  { %207 = vmatprep.subr.mxu0 %v320_v1  ;;  %239 = vmatprep.mubr.msk.f32.mxu0 %vm321_vm0, %v320_v1  ;;  %v99_v6 = vld [vmem:[#allocation16 + $0x68] sm:$0xff]  ;;  %v98_v8 = vld [vmem:[#allocation16 + $0x60] sm:$0xff]  ;;  %v71_v9 = vld [vmem:[#allocation14] sm:$0x7] }
  0x28   :  { %208 = vmatpush3.msra.mxu0 %v101_v3  ;;  %v59_v5 = vshrl.u32 %v58_v2, 7  ;;  %v64_v7 = vand.u32 127, %v58_v2  ;;  %v97_v10 = vld [vmem:[#allocation16 + $0x58] sm:$0xff]  ;;  %v96_v13 = vld [vmem:[#allocation16 + $0x50] sm:$0xff]  ;;  %v95_v14 = vld [vmem:[#allocation16 + $0x48] sm:$0xff] }
  0x29   :  { %209 = vmatprep.subr.mxu0 %v320_v1  ;;  %v94_v15 = vld [vmem:[#allocation16 + $0x40] sm:$0xff]  ;;  %v93_v16 = vld [vmem:[#allocation16 + $0x38] sm:$0xff]  ;;  %v92_v17 = vld [vmem:[#allocation16 + $0x30] sm:$0xff] }
  0x2a   :  { %210 = vmatpush3.msra.mxu0 %v100_v4  ;;  %vm61_vm1 = vcmp.lt.s32.totalorder %v59_v5, 3  ;;  %vm66_vm2 = vcmp.lt.s32.totalorder %v64_v7, 4  ;;  %v91_v18 = vld [vmem:[#allocation16 + $0x28] sm:$0xff]  ;;  %v90_v19 = vld [vmem:[#allocation16 + $0x20] sm:$0xff]  ;;  %v89_v20 = vld [vmem:[#allocation16 + $0x18] sm:$0xff] }
  0x2b   :  { %211 = vmatprep.subr.mxu0 %v320_v1  ;;  %v76_v11 = vsel %vm61_vm1, %v71_v9, %v355_v0  ;;  %v57_v21 = vld [vmem:[#allocation12] sm:$0x7]  ;;  %v88_v22 = vld [vmem:[#allocation16 + $0x10] sm:$0xff]  ;;  %v87_v23 = vld [vmem:[#allocation16 + $0x8] sm:$0xff] }
  0x2c   :  { %212 = vmatpush3.msra.mxu0 %v99_v6  ;;  %v81_v12 = vsel %vm66_vm2, %v76_v11, %v355_v0  ;;  %v62_v24 = vsel %vm61_vm1, %v57_v21, %v355_v0  ;;  %v86_v25 = vld [vmem:[#allocation16] sm:$0xff]  ;;  %v189_v27 = vld [vmem:[%s381_s1] ss:$0 sm:$0xff] }
  0x2d   :  { %213 = vmatprep.subr.mxu0 %v320_v1  ;;  %v67_v26 = vsel %vm66_vm2, %v62_v24, %v355_v0 }
  0x2e   :  { %214 = vmatpush3.msra.mxu0 %v98_v8 }
  0x2f   :  { %215 = vmatprep.subr.mxu0 %v320_v1 }
  0x30   :  { %216 = vmatpush3.msra.mxu0 %v97_v10 }
  0x31   :  { %217 = vmatprep.subr.mxu0 %v320_v1 }
  0x32   :  { %218 = vmatpush3.msra.mxu0 %v96_v13 }
  0x33   :  { %219 = vmatprep.subr.mxu0 %v320_v1 }
  0x34   :  { %220 = vmatpush3.msra.mxu0 %v95_v14 }
  0x35   :  { %221 = vmatprep.subr.mxu0 %v320_v1 }
  0x36   :  { %222 = vmatpush3.msra.mxu0 %v94_v15 }
  0x37   :  { %223 = vmatprep.subr.mxu0 %v320_v1 }
  0x38   :  { %224 = vmatpush3.msra.mxu0 %v93_v16 }
  0x39   :  { %225 = vmatprep.subr.mxu0 %v320_v1 }
  0x3a   :  { %226 = vmatpush3.msra.mxu0 %v92_v17 }
  0x3b   :  { %227 = vmatprep.subr.mxu0 %v320_v1 }
  0x3c   :  { %228 = vmatpush3.msra.mxu0 %v91_v18 }
  0x3d   :  { %229 = vmatprep.subr.mxu0 %v320_v1 }
  0x3e   :  { %230 = vmatpush3.msra.mxu0 %v90_v19 }
  0x3f   :  { %231 = vmatprep.subr.mxu0 %v320_v1 }
  0x40   :  { %232 = vmatpush3.msra.mxu0 %v89_v20 }
  0x41   :  { %233 = vmatprep.subr.mxu0 %v320_v1 }
  0x42   :  { %234 = vmatpush3.msra.mxu0 %v88_v22 }
  0x43   :  { %235 = vmatprep.subr.mxu0 %v320_v1 }
  0x44   :  { %236 = vmatpush3.msra.mxu0 %v87_v23 }
  0x45   :  { %237 = vmatprep.subr.mxu0 %v320_v1 }
  0x46   :  { %238 = vmatpush3.msra.mxu0 %v86_v25 }
  0x47   :  { %240 = vmatmul.mubr.f32.vlgmr.msra.gmra.mxu0 %v67_v26 }
 0x107   :  { %v175_v28 = vpop.f32.mrf.mxu0 }
 0x108   :  { %v176_v29 = vadd.f32 %v189_v27, %v175_v28 }
 0x109   :  { %v241_v30 = vpop.f32.mrf.mxu0 }
 0x10a   :  { %v180_v31 = vadd.f32 %v176_v29, %v81_v12 }
 0x10c   :  { %249 = vtanh.f32 %v180_v31 }
 0x119   :  { %v250_v32 = vpop.eup %249 }
 0x11a   :  { %182 = vst [vmem:[%s385_s5] sm:$0xff] %v250_v32 }
 0x11b   :  { %187 = vsyncpa [#allocation13], 1 }
 0x11c   :  { %188 = vsyncpa [#allocation15], 1 }

</bundles_post_ra>
